<compile_context>
chip_gen: v7x
topology: tpu7x:2x2x1
jax: 0.10.0
libtpu: 0.0.40
codegen_flags: <defaults>
</compile_context>

<pallas_src>
import jax
import jax.numpy as jnp
from jax.experimental import pallas as pl
from jax.experimental.pallas import tpu as pltpu

IN_DIM = 30            # nn.Linear(30, 16)
IN_PAD = 32            # padded feature width: [x (30), ones (1), zeros (1)]
HID_DIM = 16
OUT_DIM = 2
PACK_ROWS = HID_DIM + 1  # 16 rows of W1_aug^T + 1 row of [w_delta | b_delta | 0]


def mlp_kernel(xt_ref, p_ref, o_ref):
    xt = xt_ref[...]                                         # (32, TB)
    p = p_ref[...]                                           # (17, 32) f32
    w1t = p[:HID_DIM, :].astype(xt.dtype)                    # (16, 32)  W1_aug^T
    w_delta = p[HID_DIM:HID_DIM + 1, :HID_DIM]               # (1, 16)   W2[:,0]-W2[:,1]
    b_delta = p[HID_DIM:HID_DIM + 1, HID_DIM:HID_DIM + 1]    # (1, 1)    b2[0]-b2[1]

    # fully_connected1 + ReLU; b1 is folded in via the ones row of xt.
    ht = jnp.dot(w1t, xt, preferred_element_type=jnp.float32)   # (16, TB)
    ht = jnp.maximum(ht, 0.0)

    # Collapsed 2-class head: d = z0 - z1 = w_delta @ h^T + b_delta   (1, TB)
    d = jnp.dot(w_delta, ht, preferred_element_type=jnp.float32) + b_delta

    # log_softmax over 2 classes: lse = z1 + softplus(d), softplus via log1p.
    #   out0 = z0 - lse = d - softplus(d);  out1 = z1 - lse = -softplus(d)
    sp = jnp.maximum(d, 0.0) + jnp.log1p(jnp.exp(-jnp.abs(d)))
    o_ref[...] = jnp.concatenate([d - sp, -sp], axis=0)      # (2, TB) lane-dense


def pack_params(w1, b1, w2, b2):
    """Pack (30,16), (16,), (16,2), (2,) params into one (17, 32) f32 buffer.

    Rows [0, 16): W1_aug^T = [W1^T | b1 | 0]   (bias folded via ones row of x^T)
    Row  16     : [w_delta (16) | b_delta (1) | zeros (15)]
    """
    w1 = jnp.asarray(w1, jnp.float32).reshape(IN_DIM, HID_DIM)
    b1 = jnp.asarray(b1, jnp.float32).reshape(HID_DIM)
    w2 = jnp.asarray(w2, jnp.float32).reshape(HID_DIM, OUT_DIM)
    b2 = jnp.asarray(b2, jnp.float32).reshape(OUT_DIM)

    w1t_aug = jnp.concatenate(
        [w1.T, b1[:, None],
         jnp.zeros((HID_DIM, IN_PAD - IN_DIM - 1), jnp.float32)], axis=1)  # (16, 32)
    w_delta = w2[:, 0] - w2[:, 1]                                           # (16,)
    b_delta = b2[0] - b2[1]
    tail = jnp.concatenate(
        [w_delta, jnp.array([b_delta], jnp.float32),
         jnp.zeros((IN_PAD - HID_DIM - 1,), jnp.float32)])[None, :]         # (1, 32)
    return jnp.concatenate([w1t_aug, tail], axis=0)                         # (17, 32)


def _cdiv(a, b):
    return -(-a // b)


def _round_up(n, m):
    return ((n + m - 1) // m) * m


def simple_neural_network(x, w1, b1, w2, b2, *, max_batch_tile=16384,
                          input_dtype=jnp.float32):
    """Forward pass equivalent to the PyTorch Simple_Neural_Network."""
    # TODO(synk): for tiny batches (B <~ 1K) XLA fusion of this 30x16x2 MLP in
    # the caller beats a standalone pallas_call launch; kept on the kernel
    # path here so the kernel is exercised.
    B = x.shape[0]
    x = jnp.asarray(x, input_dtype)
    itemsize = jnp.dtype(input_dtype).itemsize

    # --- batch-tile selection -------------------------------------------
    # Cap double-buffered (x tile + out tile) footprint at ~24 MiB (v7x safe).
    per_lane_bytes = 2 * (IN_PAD * itemsize + OUT_DIM * 4)
    tile_cap = max(128, (24 * 1024 * 1024 // per_lane_bytes) // 128 * 128)
    max_tile = max(128, min(int(max_batch_tile), tile_cap))

    n_steps = _cdiv(B, max_tile)
    if n_steps > 1 and n_steps % 2 == 1:
        n_steps += 1                       # even step count -> both v7x TCs busy
    tb = _round_up(_cdiv(B, n_steps), 128)  # batch lives on the lane axis
    b_pad = tb * n_steps                    # < 128 (+ even-step slack) rows padding

    # --- input layout: x^T with b1's ones row, batch on lanes ------------
    x_aug = jnp.concatenate(
        [x, jnp.ones((B, 1), input_dtype),
         jnp.zeros((B, IN_PAD - IN_DIM - 1), input_dtype)], axis=1)   # (B, 32)
    if b_pad != B:
        x_aug = jnp.pad(x_aug, ((0, b_pad - B), (0, 0)))
    xt = x_aug.T                                                       # (32, b_pad)

    params = pack_params(w1, b1, w2, b2)

    # --- compiler params: raise scoped VMEM only when the tile needs it --
    vmem_needed = per_lane_bytes * tb + 2 * PACK_ROWS * IN_PAD * 4
    cp_kwargs = dict(dimension_semantics=("parallel",))
    if vmem_needed > 12 * 1024 * 1024:     # beyond v5e's 16 MiB scoped default
        cp_kwargs["vmem_limit_bytes"] = int(
            min(max(2 * vmem_needed, 32 * 1024 * 1024), 48 * 1024 * 1024))

    out_t = pl.pallas_call(
        mlp_kernel,
        out_shape=jax.ShapeDtypeStruct((OUT_DIM, b_pad), jnp.float32),
        grid=(n_steps,),
        in_specs=[
            pl.BlockSpec((IN_PAD, tb), lambda i: (0, i)),         # batch tile (lanes)
            pl.BlockSpec((PACK_ROWS, IN_PAD), lambda i: (0, 0)),  # resident params
        ],
        out_specs=pl.BlockSpec((OUT_DIM, tb), lambda i: (0, i)),  # lane-dense out
        compiler_params=pltpu.CompilerParams(**cp_kwargs),
    )(xt, params)
    return out_t.T[:B]                                            # (B, 2)


def init_params(key):
    # Mimic nn.Linear's uniform(-1/sqrt(fan_in), 1/sqrt(fan_in)) init.
    k1, k2, k3, k4 = jax.random.split(key, 4)
    bound1 = 1.0 / jnp.sqrt(IN_DIM)
    bound2 = 1.0 / jnp.sqrt(HID_DIM)
    w1 = jax.random.uniform(k1, (IN_DIM, HID_DIM), jnp.float32, -bound1, bound1)
    b1 = jax.random.uniform(k2, (HID_DIM,), jnp.float32, -bound1, bound1)
    w2 = jax.random.uniform(k3, (HID_DIM, OUT_DIM), jnp.float32, -bound2, bound2)
    b2 = jax.random.uniform(k4, (OUT_DIM,), jnp.float32, -bound2, bound2)
    return w1, b1, w2, b2


if __name__ == "__main__":
    key = jax.random.PRNGKey(0)
    kx, kx2, kp = jax.random.split(key, 3)
    w1, b1, w2, b2 = init_params(kp)

    def reference(xr):
        h = jnp.maximum(xr @ w1 + b1[None, :], 0.0)
        z = h @ w2 + b2[None, :]
        return jax.nn.log_softmax(z, axis=1)

    # 1) Small-batch check (single grid step, f32, tight tolerance).
    B = 8
    x = jax.random.normal(kx, (B, IN_DIM), jnp.float32)
    out = simple_neural_network(x, w1, b1, w2, b2)
    jax.block_until_ready(out)
    assert out.shape == (B, OUT_DIM)
    assert jnp.allclose(out, reference(x), atol=1e-5, rtol=1e-5), "f32 mismatch"

    # 2) Multi-step check (exercises batch tiling, even-step rounding, padding).
    B2 = 300
    x2 = jax.random.normal(kx2, (B2, IN_DIM), jnp.float32)
    out2 = simple_neural_network(x2, w1, b1, w2, b2, max_batch_tile=128)
    jax.block_until_ready(out2)
    assert out2.shape == (B2, OUT_DIM)
    assert jnp.allclose(out2, reference(x2), atol=1e-5, rtol=1e-5), "tiled mismatch"

    # 3) Optional bf16 input stream (halves HBM read traffic for large B).
    out3 = simple_neural_network(x2, w1, b1, w2, b2, max_batch_tile=128,
                                 input_dtype=jnp.bfloat16)
    jax.block_until_ready(out3)
    assert jnp.allclose(out3, reference(x2), atol=5e-2, rtol=5e-2), "bf16 mismatch"

    print("KERNEL_OK")
</pallas_src>

<mosaic_0001>
module attributes {stable_mosaic.version = 11 : i64} {
  func.func @mlp_kernel(%arg0: i32, %arg1: memref<32x128xf32, #tpu.memory_space<vmem>>, %arg2: memref<17x32xf32, #tpu.memory_space<vmem>>, %arg3: memref<2x128xf32, #tpu.memory_space<vmem>>) attributes {dimension_semantics = [#tpu.dimension_semantics<parallel>], iteration_bounds = array<i64: 1>, scalar_prefetch = 0 : i64, scratch_operands = 0 : i64, tpu.core_type = #tpu.core_type<tc>, window_params = [{transform_indices = @transform_0, window_bounds = array<i64: 32, 128>}, {pipeline_mode = #tpu.pipeline_mode<synchronous>, transform_indices = @transform_1, window_bounds = array<i64: 17, 32>}, {transform_indices = @transform_2, window_bounds = array<i64: 2, 128>}]} {
    %c0 = arith.constant 0 : index
    %c0_0 = arith.constant 0 : index
    %0 = vector.load %arg1[%c0, %c0_0] : memref<32x128xf32, #tpu.memory_space<vmem>>, vector<32x128xf32>
    %c0_1 = arith.constant 0 : index
    %c0_2 = arith.constant 0 : index
    %1 = vector.load %arg2[%c0_1, %c0_2] : memref<17x32xf32, #tpu.memory_space<vmem>>, vector<17x32xf32>
    %2 = vector.extract_strided_slice %1 {offsets = [0, 0], sizes = [16, 32], strides = [1, 1]} : vector<17x32xf32> to vector<16x32xf32>
    %3 = vector.extract_strided_slice %1 {offsets = [16, 0], sizes = [1, 16], strides = [1, 1]} : vector<17x32xf32> to vector<1x16xf32>
    %4 = vector.extract_strided_slice %1 {offsets = [16, 16], sizes = [1, 1], strides = [1, 1]} : vector<17x32xf32> to vector<1x1xf32>
    %cst = arith.constant dense<0.000000e+00> : vector<16x128xf32>
    %5 = tpu.matmul %2, %0, %cst {dimension_numbers = #tpu.dot_dimension_numbers<[1], [0], [0], [1], [0, 0, 1, 1], [], []>} : vector<16x32xf32>, vector<32x128xf32>, vector<16x128xf32> -> vector<16x128xf32>
    %cst_3 = arith.constant 0.000000e+00 : f32
    %6 = vector.broadcast %cst_3 : f32 to vector<16x128xf32>
    %7 = arith.maximumf %5, %6 : vector<16x128xf32>
    %cst_4 = arith.constant dense<0.000000e+00> : vector<1x128xf32>
    %8 = tpu.matmul %3, %7, %cst_4 {dimension_numbers = #tpu.dot_dimension_numbers<[1], [0], [0], [1], [0, 0, 1, 1], [], []>} : vector<1x16xf32>, vector<16x128xf32>, vector<1x128xf32> -> vector<1x128xf32>
    %9 = vector.broadcast %4 : vector<1x1xf32> to vector<1x128xf32>
    %10 = arith.addf %8, %9 : vector<1x128xf32>
    %cst_5 = arith.constant 0.000000e+00 : f32
    %11 = vector.broadcast %cst_5 : f32 to vector<1x128xf32>
    %12 = arith.maximumf %10, %11 : vector<1x128xf32>
    %13 = math.absf %10 : vector<1x128xf32>
    %cst_6 = arith.constant 0.000000e+00 : f32
    %14 = vector.broadcast %cst_6 : f32 to vector<1x128xf32>
    %15 = arith.subf %14, %13 : vector<1x128xf32>
    %16 = math.exp %15 : vector<1x128xf32>
    %17 = math.log1p %16 : vector<1x128xf32>
    %18 = arith.addf %12, %17 : vector<1x128xf32>
    %19 = arith.subf %10, %18 : vector<1x128xf32>
    %cst_7 = arith.constant 0.000000e+00 : f32
    %20 = vector.broadcast %cst_7 : f32 to vector<1x128xf32>
    %21 = arith.subf %20, %18 : vector<1x128xf32>
    %22 = tpu.concatenate %19, %21 in 0 : vector<1x128xf32>, vector<1x128xf32> -> vector<2x128xf32>
    %c0_8 = arith.constant 0 : index
    %c0_9 = arith.constant 0 : index
    %23 = vector.load %arg3[%c0_8, %c0_9] : memref<2x128xf32, #tpu.memory_space<vmem>>, vector<2x128xf32>
    tpu.vector_store %arg3[%c0_8, %c0_9], %22 {strides = array<i32>} : memref<2x128xf32, #tpu.memory_space<vmem>>, vector<2x128xf32>,
    return
  }
  func.func @transform_0(%arg0: i32) -> (i32, i32) {
    %c0_i32 = arith.constant 0 : i32
    %c0_i32_0 = arith.constant 0 : i32
    return %c0_i32, %arg0 : i32, i32
  }
  func.func @transform_1(%arg0: i32) -> (i32, i32) {
    %c0_i32 = arith.constant 0 : i32
    %c0_i32_0 = arith.constant 0 : i32
    %c0_i32_1 = arith.constant 0 : i32
    return %c0_i32, %c0_i32_0 : i32, i32
  }
  func.func @transform_2(%arg0: i32) -> (i32, i32) {
    %c0_i32 = arith.constant 0 : i32
    %c0_i32_0 = arith.constant 0 : i32
    return %c0_i32, %arg0 : i32, i32
  }
}

</mosaic_0001>

<bundles_post_ra>
// kernel: tpu_custom_call.1
= control target key start
LH: loop header
LB: loop body
LE: loop exit
PB: predicated region body
PF: predicated region fallthrough
CT: control target
= control target key end

     0   :  { %7 = vsyncpa [#allocation3], 0  ;;  %s435_s0 = inlined_call_operand.hbm [shape: f32[32,128], index: 0, kind: input, shape index: {}]   ;;  %s436_s1 = inlined_call_operand.hbm [shape: f32[17,32], index: 1, kind: input, shape index: {}]   ;;  %s437_s2 = inlined_call_operand.hbm [shape: f32[2,128], index: 2, kind: output, shape index: {}]  }
   0x1   :  { %8 = vsyncpa [#allocation6], 0 }
   0x2   :  { %9 = vsyncpa [#allocation4], 0  ;;  %s375_s9 = smov [#allocation2]   ;;  %s303_s13 = scalar_lea.hbm %s435_s0, 512 }
   0x3   :  { %s15_s10 = sshll.u32 %s375_s9, 4  ;;  %p304_p0 = scmp.ne.s32.totalorder %s435_s0, %s303_s13  ;;  %s16_s10 = int_to_ptr.vmem [resolvable:$true] %s15_s10 }
   0x4   :  { %p307_p1 = scmp.lt.u32.totalorder %s303_s13, %s435_s0 }
   0x6   :  { %p309_p2 = pnand %p307_p1, %p304_p0 }
   0x8   :  { %312 = shalt.err (!%p309_p2)
}
   0x9   :  { %s313_s18 = scalar_lea.vmem %s16_s10, 512  ;;  %p318_p4 = scmp.lt.s32.totalorder %s16_s10, %s16_s10 }
   0xa   :  { %p314_p3 = scmp.ne.s32.totalorder %s16_s10, %s313_s18  ;;  %p319_p5 = scmp.lt.s32.totalorder %s313_s18, %s313_s18 }
   0xc   :  { %p320_p6 = por %p319_p5, %p318_p4 }
   0xe   :  { %p321_p7 = pnand %p320_p6, %p314_p3 }
  0x10   :  { %324 = shalt.err (!%p321_p7)
}
  0x11   :  { %s376_s19 = smov 128   ;;  %s377_s20 = smov 8  }
  0x12   :  { %21 = dma.hbm_to_vmem [thread:$0]  %s435_s0, 512, %s16_s10, [#allocation3], %s376_s19, %s376_s19, %s377_s20  }
  0x13   :  { %s378_s23 = smov [#allocation5]   ;;  %s325_s27 = scalar_lea.hbm %s436_s1, 384 }
  0x14   :  { %s27_s24 = sshll.u32 %s378_s23, 4  ;;  %p326_p8 = scmp.ne.s32.totalorder %s436_s1, %s325_s27  ;;  %s28_s24 = int_to_ptr.vmem [resolvable:$true] %s27_s24 }
  0x15   :  { %p329_p9 = scmp.lt.u32.totalorder %s325_s27, %s436_s1 }
  0x17   :  { %p331_p10 = pnand %p329_p9, %p326_p8 }
  0x19   :  { %334 = shalt.err (!%p331_p10)
}
  0x1a   :  { %s335_s4 = scalar_lea.vmem %s28_s24, 384  ;;  %p340_p12 = scmp.lt.s32.totalorder %s28_s24, %s28_s24 }
  0x1b   :  { %p336_p11 = scmp.ne.s32.totalorder %s28_s24, %s335_s4  ;;  %p341_p13 = scmp.lt.s32.totalorder %s335_s4, %s335_s4 }
  0x1d   :  { %p342_p0 = por %p341_p13, %p340_p12 }
  0x1f   :  { %p343_p1 = pnand %p342_p0, %p336_p11 }
  0x21   :  { %346 = shalt.err (!%p343_p1)
}
  0x22   :  { %33 = dma.hbm_to_vmem [thread:$0]  %s436_s1, 384, %s28_s24, [#allocation6], %s376_s19, %s376_s19, %s377_s20  }
  0x23   :  { %369 = dma.done.wait [#allocation3], 512  }
  0x24   :  { %370 = vsyncadd [#allocation3], 4294966784 }
  0x25   :  { %371 = dma.done.wait [#allocation6], 384  }
  0x26   :  { %372 = vsyncadd [#allocation6], 4294966912  ;;  %vm47_vm0 = vcmask 261120   ;;  %v40_v0 = vld [vmem:[#allocation2] sm:$0xff]  ;;  %v41_v1 = vld [vmem:[#allocation2 + $0x8] sm:$0xff]  ;;  %v379_v8 = vmov 0.0|0.0  }
  0x27   :  { %v42_v2 = vld [vmem:[#allocation2 + $0x10] sm:$0xff]  ;;  %v278_v3 = vpack.c.bf16 %v41_v1, %v40_v0  ;;  %v43_v4 = vld [vmem:[#allocation2 + $0x18] sm:$0xff]  ;;  %v44_v5 = vld [vmem:[#allocation5] sm:$0xff]  ;;  %286 = vmatprep.subr.bf16.mxu1 %v379_v8  ;;  %vm380_vm1 = vmmov 0   ;;  %v381_v9 = vmov 0.0   ;;  %v382_v11 = vmov 16  }
  0x28   :  { %v282_v6 = vpack.c.bf16 %v43_v4, %v42_v2  ;;  %268 = vmatprep.mubr.msk.f32.mxu0 %vm47_vm0, %v44_v5  ;;  %v45_v7 = vld [vmem:[#allocation5 + $0x8] sm:$0xff]  ;;  %275 = vmatprep.mubr.msk.f32.mxu1 %vm380_vm1, %v381_v9  ;;  %v46_v10 = vld [vmem:[#allocation5 + $0x10] sm:$0x1]  ;;  %vm136_vm2 = vcmask 130048   ;;  %s383_s1 = smov [#allocation7]   ;;  %vm229_vm4 = vcmask 1040384  }
  0x29   :  { %279 = vmatprep.subr.bf16.mxu0 %v278_v3  ;;  %298 = vset.pattern.permute.xlu0 %v382_v11  ;;  %s238_s6 = sshll.u32 %s383_s1, 4  ;;  %s239_s6 = int_to_ptr.vmem [resolvable:$true] %s238_s6 }
  0x2a   :  { %281 = vmatpush3.bf16.msra.mxu0 %v278_v3  ;;  %133 = vperm.xlu0 %298, %v46_v10   ;;  %s347_s7 = scalar_lea.vmem %s239_s6, 32  ;;  %p352_p3 = scmp.lt.s32.totalorder %s239_s6, %s239_s6 }
  0x2b   :  { %283 = vmatprep.subr.bf16.mxu0 %v282_v6  ;;  %p348_p2 = scmp.ne.s32.totalorder %s239_s6, %s347_s7  ;;  %p353_p4 = scmp.lt.s32.totalorder %s347_s7, %s347_s7 }
  0x2d   :  { %p354_p5 = por %p353_p4, %p352_p3 }
  0x2e   :  { %285 = vmatpush3.bf16.msra.mxu0 %v282_v6 }
  0x2f   :  { %p355_p6 = pnand %p354_p5, %p348_p2 }
  0x31   :  { %269 = vmatmul.mubr.msk.f32.vlgmr.msra.gmra.mrb[0].mxu0 %vm47_vm0, %v45_v7 }
  0xa9   :  { %v134_v17 = vpop.permute.xlu0 %133 }
 0x104   :  { %v270_v12 = vpop.f32.mrb[0].mxu0 }
 0x105   :  { %v130_v13 = vmax.f32 %v270_v12, 0.0  ;;  %v120_v14 = vpop.f32.mrb[1].mxu0 }
 0x106   :  { %v129_v15 = vmax.f32 %v120_v14, 0.0 }
 0x108   :  { %v287_v16 = vpack.c.bf16 %v130_v13, %v129_v15 }
 0x10a   :  { %288 = vmatpush3.bf16.msra.mxu1 %v287_v16 }
 0x10d   :  { %276 = vmatmul.mubr.msk.f32.vlgmr.msra.gmra.mrb[0].mxu1 %vm136_vm2, %v46_v10 }
 0x1e0   :  { %v205_v18 = vpop.f32.mrb[0].mxu1 }
 0x1e1   :  { %v206_v19 = vadd.f32 %v205_v18, %v134_v17  ;;  %v277_v20 = vpop.f32.mrb[1].mxu1 }
 0x1e3   :  { %v210_v21 = vand.u32 2147483647, %v206_v19  ;;  %v209_v32 = vmax.f32 %v206_v19, 0.0 }
 0x1e5   :  { %v211_v22 = vsub.f32 0.0, %v210_v21 }
 0x1e7   :  { %v212_v23 = vmul.f32 1.442695, %v211_v22 }
 0x1e9   :  { %299 = vpow2.f32 %v212_v23 }
 0x1f3   :  { %v300_v24 = vpop.eup %299 }
 0x1f4   :  { %v214_v25 = vadd.f32 1.0, %v300_v24  ;;  %v217_v26 = vmul.f32 -0.5, %v300_v24  ;;  %v220_v28 = vand.u32 2147483647, %v300_v24 }
 0x1f6   :  { %301 = vlog2.f32 %v214_v25  ;;  %v218_v27 = vadd.f32 1.0, %v217_v26  ;;  %vm221_vm3 = vcmp.lt.f32.partialorder %v220_v28, 0.0004427343 }
 0x1f8   :  { %v219_v31 = vmul.f32 %v300_v24, %v218_v27 }
 0x200   :  { %v302_v29 = vpop.eup %301 }
 0x201   :  { %v216_v30 = vmul.f32 0.6931472, %v302_v29 }
 0x203   :  { %v222_v33 = vsel %vm221_vm3, %v219_v31, %v216_v30 }
 0x204   :  { %v223_v34 = vadd.f32 %v222_v33, %v209_v32 }
 0x206   :  { %v225_v35 = vsub.f32 0.0, %v223_v34  ;;  %v224_v36 = vsub.f32 %v206_v19, %v223_v34 }
 0x208   :  { %v227_v37 = vrot.slane %v225_v35, 7 }
 0x20a   :  { %v230_v38 = vsel %vm229_vm4, %v224_v36, %v227_v37 }
 0x20b   :  { %231 = vst [vmem:[#allocation7] sm:$0x3] %v230_v38 }
 0x20c   :  { %358 = shalt.err (!%p355_p6)
}
 0x20d   :  { %s359_s10 = scalar_lea.hbm %s437_s2, 32 }
 0x20e   :  { %p360_p7 = scmp.ne.s32.totalorder %s437_s2, %s359_s10  ;;  %p363_p8 = scmp.lt.u32.totalorder %s359_s10, %s437_s2 }
 0x210   :  { %p365_p9 = pnand %p363_p8, %p360_p7 }
 0x212   :  { %368 = shalt.err (!%p365_p9)
}
 0x213   :  { %241 = dma.vmem_to_hbm [thread:$0]  %s239_s6, 32, %s437_s2, [#allocation4]  }
 0x214   :  { %373 = dma.done.wait [#allocation4], 32  }
 0x215   :  { %374 = vsyncadd [#allocation4], 4294967264 }
 0x216   :  { %245 = vsyncpa [#allocation3], 1 }
 0x217   :  { %246 = vsyncpa [#allocation6], 1 }
 0x218   :  { %247 = vsyncpa [#allocation4], 1 }

</bundles_post_ra>
